<compile_context>
chip_gen: v5e
topology: v5e:2x2
jax: 0.10.0
libtpu: 0.0.40
codegen_flags: <defaults>
</compile_context>

<pallas_src>
import jax
import jax.numpy as jnp
from jax.experimental import pallas as pl
from jax.experimental.pallas import tpu as pltpu

LOG_STD_MIN = -20.0
LOG_STD_MAX = 2.0


def _round_up(x, m):
    return (x + m - 1) // m * m


def _policy_kernel(state_ref, w1_ref, b1_ref, w2_ref, b2_ref,
                   wm_ref, bm_ref, ws_ref, bs_ref,
                   mean_ref, log_std_ref):
    """One batch tile: two hidden layers + mean / log_std heads.

    Matmul inputs (state / hidden activations AND weights) run in the weight
    dtype (bf16 by default, MXU-native); accumulation is always f32 via
    preferred_element_type; bias-add / ReLU / clamp stay in f32 on the VPU.
    """
    wdt = w1_ref.dtype

    # hidden layer 1 (MXU matmul, f32 accumulate)
    x = jnp.dot(state_ref[...].astype(wdt), w1_ref[...],
                preferred_element_type=jnp.float32)
    x = jnp.maximum(x + b1_ref[...], 0.0)

    # hidden layer 2
    x = jnp.dot(x.astype(wdt), w2_ref[...], preferred_element_type=jnp.float32)
    x = jnp.maximum(x + b2_ref[...], 0.0)

    # heads: narrow (N = num_actions) matmuls, one dense store each per tile
    xc = x.astype(wdt)
    mean = jnp.dot(xc, wm_ref[...],
                   preferred_element_type=jnp.float32) + bm_ref[...]
    log_std = jnp.dot(xc, ws_ref[...],
                      preferred_element_type=jnp.float32) + bs_ref[...]

    mean_ref[...] = mean.astype(mean_ref.dtype)
    log_std_ref[...] = jnp.clip(log_std, LOG_STD_MIN,
                                LOG_STD_MAX).astype(log_std_ref.dtype)


def prepare_params(params, *, weights_dtype=jnp.bfloat16):
    """One-time per-model prep (hoisted out of the forward path): cast the
    weight matrices to the MXU-native dtype; biases stay f32 (added after the
    f32-accumulated matmul)."""
    w1, b1, w2, b2, wm, bm, ws, bs = params
    return (w1.astype(weights_dtype), b1.astype(jnp.float32),
            w2.astype(weights_dtype), b2.astype(jnp.float32),
            wm.astype(weights_dtype), bm.astype(jnp.float32),
            ws.astype(weights_dtype), bs.astype(jnp.float32))


def _pick_tm(batch, block_batch):
    """Batch-tile height.  Tiny batches: one full-dim tile (legal even when
    B % 8 != 0; overhead-bound anyway).  Large batches: multiple-of-8 tiles,
    capped at block_batch, split into >= 2 tiles so the 'parallel' batch axis
    can use both v7x TensorCores."""
    if batch <= 256:
        return batch
    half = _round_up((batch + 1) // 2, 8)
    return min(block_batch, half)


def policy_forward(state, prepared_params, *, block_batch=1024):
    """state: [B, num_inputs] f32 -> (mean [B, A], log_std [B, A]) f32."""
    w1, b1, w2, b2, wm, bm, ws, bs = prepared_params
    B, num_inputs = state.shape
    H = w1.shape[1]
    A = wm.shape[1]

    TM = _pick_tm(B, block_batch)
    grid = (pl.cdiv(B, TM),)

    args = (state, w1, b1, w2, b2, wm, bm, ws, bs)
    bytes_accessed = (sum(int(a.size) * a.dtype.itemsize for a in args)
                      + 2 * B * A * 4)
    flops = 2 * B * (num_inputs * H + H * H + 2 * H * A)

    mean, log_std = pl.pallas_call(
        _policy_kernel,
        out_shape=(jax.ShapeDtypeStruct((B, A), jnp.float32),
                   jax.ShapeDtypeStruct((B, A), jnp.float32)),
        grid=grid,
        in_specs=[
            pl.BlockSpec((TM, num_inputs), lambda i: (i, 0)),   # state tile
            pl.BlockSpec((num_inputs, H), lambda i: (0, 0)),    # W1 (resident)
            pl.BlockSpec((1, H), lambda i: (0, 0)),             # b1
            pl.BlockSpec((H, H), lambda i: (0, 0)),             # W2 (resident)
            pl.BlockSpec((1, H), lambda i: (0, 0)),             # b2
            pl.BlockSpec((H, A), lambda i: (0, 0)),             # W_mean
            pl.BlockSpec((1, A), lambda i: (0, 0)),             # b_mean
            pl.BlockSpec((H, A), lambda i: (0, 0)),             # W_log_std
            pl.BlockSpec((1, A), lambda i: (0, 0)),             # b_log_std
        ],
        out_specs=(pl.BlockSpec((TM, A), lambda i: (i, 0)),
                   pl.BlockSpec((TM, A), lambda i: (i, 0))),
        compiler_params=pltpu.CompilerParams(
            dimension_semantics=("parallel",)),
        cost_estimate=pl.CostEstimate(
            flops=flops, transcendentals=0, bytes_accessed=bytes_accessed),
    )(*args)
    return mean, log_std


def init_policy_params(key, num_inputs, num_actions, hidden_size=256, init_w=0.003):
    """Deterministic init mirroring the PyTorch module:
       - linear1/linear2: default nn.Linear init U(-1/sqrt(fan_in), +1/sqrt(fan_in))
       - mean/log_std heads: U(-init_w, +init_w)
       Weights are returned as [in, out] (already transposed vs. PyTorch)."""
    ks = jax.random.split(key, 8)

    def uniform(k, shape, bound):
        return jax.random.uniform(k, shape, jnp.float32, -bound, bound)

    bnd1 = 1.0 / jnp.sqrt(num_inputs)
    bnd2 = 1.0 / jnp.sqrt(hidden_size)

    w1 = uniform(ks[0], (num_inputs, hidden_size), bnd1)
    b1 = uniform(ks[1], (1, hidden_size), bnd1)
    w2 = uniform(ks[2], (hidden_size, hidden_size), bnd2)
    b2 = uniform(ks[3], (1, hidden_size), bnd2)
    wm = uniform(ks[4], (hidden_size, num_actions), init_w)
    bm = uniform(ks[5], (1, num_actions), init_w)
    ws = uniform(ks[6], (hidden_size, num_actions), init_w)
    bs = uniform(ks[7], (1, num_actions), init_w)
    return (w1, b1, w2, b2, wm, bm, ws, bs)


def policy_forward_ref(state, params):
    """Pure-JAX reference for correctness checking."""
    w1, b1, w2, b2, wm, bm, ws, bs = params
    x = jnp.maximum(state @ w1 + b1, 0.0)
    x = jnp.maximum(x @ w2 + b2, 0.0)
    mean = x @ wm + bm
    log_std = jnp.clip(x @ ws + bs, LOG_STD_MIN, LOG_STD_MAX)
    return mean, log_std


# TODO(synk): PolicyNetwork.sample() (Normal.rsample / tanh / log_prob) is not
# part of forward() and is left to plain JAX outside this kernel.

if __name__ == "__main__":
    # Pendulum-v0: observation dim 3, action dim 1.
    batch, num_inputs, num_actions, hidden = 2, 3, 1, 256

    key = jax.random.PRNGKey(0)
    k_params, k_state, k_big = jax.random.split(key, 3)
    params = init_policy_params(k_params, num_inputs, num_actions, hidden)
    state = jax.random.normal(k_state, (batch, num_inputs), dtype=jnp.float32)
    mean_ref, log_std_ref = policy_forward_ref(state, params)

    # --- small batch, f32 weights (strict check) ---
    prep_f32 = prepare_params(params, weights_dtype=jnp.float32)
    mean, log_std = policy_forward(state, prep_f32)
    jax.block_until_ready((mean, log_std))
    assert mean.shape == (batch, num_actions)
    assert log_std.shape == (batch, num_actions)
    assert jnp.allclose(mean, mean_ref, atol=1e-5, rtol=1e-5)
    assert jnp.allclose(log_std, log_std_ref, atol=1e-5, rtol=1e-5)

    # --- larger batch exercising the ragged, 2-tile grid (TM=304, grid=(2,)) ---
    big_state = jax.random.normal(k_big, (600, num_inputs), dtype=jnp.float32)
    mean_b, log_std_b = policy_forward(big_state, prep_f32)
    jax.block_until_ready((mean_b, log_std_b))
    mean_b_ref, log_std_b_ref = policy_forward_ref(big_state, params)
    assert mean_b.shape == (600, num_actions)
    assert log_std_b.shape == (600, num_actions)
    assert jnp.allclose(mean_b, mean_b_ref, atol=1e-4, rtol=1e-4)
    assert jnp.allclose(log_std_b, log_std_b_ref, atol=1e-4, rtol=1e-4)

    # --- bf16 matmul inputs (default, MXU-native), loose tolerance vs f32 ref ---
    prep_bf16 = prepare_params(params)
    mean_bf, log_std_bf = policy_forward(state, prep_bf16)
    jax.block_until_ready((mean_bf, log_std_bf))
    assert jnp.allclose(mean_bf, mean_ref, atol=5e-2)
    assert jnp.allclose(log_std_bf, log_std_ref, atol=5e-2)

    print("KERNEL_OK")
</pallas_src>

<mosaic_0001>
module attributes {stable_mosaic.version = 11 : i64} {
  func.func @_policy_kernel(%arg0: i32, %arg1: memref<2x3xf32, #tpu.memory_space<vmem>>, %arg2: memref<3x256xf32, #tpu.memory_space<vmem>>, %arg3: memref<1x256xf32, #tpu.memory_space<vmem>>, %arg4: memref<256x256xf32, #tpu.memory_space<vmem>>, %arg5: memref<1x256xf32, #tpu.memory_space<vmem>>, %arg6: memref<256x1xf32, #tpu.memory_space<vmem>>, %arg7: memref<1x1xf32, #tpu.memory_space<vmem>>, %arg8: memref<256x1xf32, #tpu.memory_space<vmem>>, %arg9: memref<1x1xf32, #tpu.memory_space<vmem>>, %arg10: memref<2x1xf32, #tpu.memory_space<vmem>>, %arg11: memref<2x1xf32, #tpu.memory_space<vmem>>) attributes {dimension_semantics = [#tpu.dimension_semantics<parallel>], iteration_bounds = array<i64: 1>, scalar_prefetch = 0 : i64, scratch_operands = 0 : i64, tpu.core_type = #tpu.core_type<tc>, window_params = [{transform_indices = @transform_0, window_bounds = array<i64: 2, 3>}, {pipeline_mode = #tpu.pipeline_mode<synchronous>, transform_indices = @transform_1, window_bounds = array<i64: 3, 256>}, {pipeline_mode = #tpu.pipeline_mode<synchronous>, transform_indices = @transform_2, window_bounds = array<i64: 1, 256>}, {pipeline_mode = #tpu.pipeline_mode<synchronous>, transform_indices = @transform_3, window_bounds = array<i64: 256, 256>}, {pipeline_mode = #tpu.pipeline_mode<synchronous>, transform_indices = @transform_4, window_bounds = array<i64: 1, 256>}, {pipeline_mode = #tpu.pipeline_mode<synchronous>, transform_indices = @transform_5, window_bounds = array<i64: 256, 1>}, {pipeline_mode = #tpu.pipeline_mode<synchronous>, transform_indices = @transform_6, window_bounds = array<i64: 1, 1>}, {pipeline_mode = #tpu.pipeline_mode<synchronous>, transform_indices = @transform_7, window_bounds = array<i64: 256, 1>}, {pipeline_mode = #tpu.pipeline_mode<synchronous>, transform_indices = @transform_8, window_bounds = array<i64: 1, 1>}, {transform_indices = @transform_9, window_bounds = array<i64: 2, 1>}, {transform_indices = @transform_10, window_bounds = array<i64: 2, 1>}]} {
    %c0 = arith.constant 0 : index
    %c0_0 = arith.constant 0 : index
    %0 = vector.load %arg1[%c0, %c0_0] : memref<2x3xf32, #tpu.memory_space<vmem>>, vector<2x3xf32>
    %c0_1 = arith.constant 0 : index
    %c0_2 = arith.constant 0 : index
    %1 = vector.load %arg2[%c0_1, %c0_2] : memref<3x256xf32, #tpu.memory_space<vmem>>, vector<3x256xf32>
    %cst = arith.constant dense<0.000000e+00> : vector<2x256xf32>
    %2 = tpu.matmul %0, %1, %cst {dimension_numbers = #tpu.dot_dimension_numbers<[1], [0], [0], [1], [0, 0, 1, 1], [], []>} : vector<2x3xf32>, vector<3x256xf32>, vector<2x256xf32> -> vector<2x256xf32>
    %c0_3 = arith.constant 0 : index
    %c0_4 = arith.constant 0 : index
    %3 = vector.load %arg3[%c0_3, %c0_4] : memref<1x256xf32, #tpu.memory_space<vmem>>, vector<1x256xf32>
    %4 = vector.broadcast %3 : vector<1x256xf32> to vector<2x256xf32>
    %5 = arith.addf %2, %4 : vector<2x256xf32>
    %cst_5 = arith.constant 0.000000e+00 : f32
    %6 = vector.broadcast %cst_5 : f32 to vector<2x256xf32>
    %7 = arith.maximumf %5, %6 : vector<2x256xf32>
    %c0_6 = arith.constant 0 : index
    %c0_7 = arith.constant 0 : index
    %8 = vector.load %arg4[%c0_6, %c0_7] : memref<256x256xf32, #tpu.memory_space<vmem>>, vector<256x256xf32>
    %cst_8 = arith.constant dense<0.000000e+00> : vector<2x256xf32>
    %9 = tpu.matmul %7, %8, %cst_8 {dimension_numbers = #tpu.dot_dimension_numbers<[1], [0], [0], [1], [0, 0, 1, 1], [], []>} : vector<2x256xf32>, vector<256x256xf32>, vector<2x256xf32> -> vector<2x256xf32>
    %c0_9 = arith.constant 0 : index
    %c0_10 = arith.constant 0 : index
    %10 = vector.load %arg5[%c0_9, %c0_10] : memref<1x256xf32, #tpu.memory_space<vmem>>, vector<1x256xf32>
    %11 = vector.broadcast %10 : vector<1x256xf32> to vector<2x256xf32>
    %12 = arith.addf %9, %11 : vector<2x256xf32>
    %cst_11 = arith.constant 0.000000e+00 : f32
    %13 = vector.broadcast %cst_11 : f32 to vector<2x256xf32>
    %14 = arith.maximumf %12, %13 : vector<2x256xf32>
    %c0_12 = arith.constant 0 : index
    %c0_13 = arith.constant 0 : index
    %15 = vector.load %arg6[%c0_12, %c0_13] : memref<256x1xf32, #tpu.memory_space<vmem>>, vector<256x1xf32>
    %cst_14 = arith.constant dense<0.000000e+00> : vector<2x1xf32>
    %16 = tpu.matmul %14, %15, %cst_14 {dimension_numbers = #tpu.dot_dimension_numbers<[1], [0], [0], [1], [0, 0, 1, 1], [], []>} : vector<2x256xf32>, vector<256x1xf32>, vector<2x1xf32> -> vector<2x1xf32>
    %c0_15 = arith.constant 0 : index
    %c0_16 = arith.constant 0 : index
    %17 = vector.load %arg7[%c0_15, %c0_16] : memref<1x1xf32, #tpu.memory_space<vmem>>, vector<1x1xf32>
    %18 = vector.broadcast %17 : vector<1x1xf32> to vector<2x1xf32>
    %19 = arith.addf %16, %18 : vector<2x1xf32>
    %c0_17 = arith.constant 0 : index
    %c0_18 = arith.constant 0 : index
    %20 = vector.load %arg8[%c0_17, %c0_18] : memref<256x1xf32, #tpu.memory_space<vmem>>, vector<256x1xf32>
    %cst_19 = arith.constant dense<0.000000e+00> : vector<2x1xf32>
    %21 = tpu.matmul %14, %20, %cst_19 {dimension_numbers = #tpu.dot_dimension_numbers<[1], [0], [0], [1], [0, 0, 1, 1], [], []>} : vector<2x256xf32>, vector<256x1xf32>, vector<2x1xf32> -> vector<2x1xf32>
    %c0_20 = arith.constant 0 : index
    %c0_21 = arith.constant 0 : index
    %22 = vector.load %arg9[%c0_20, %c0_21] : memref<1x1xf32, #tpu.memory_space<vmem>>, vector<1x1xf32>
    %23 = vector.broadcast %22 : vector<1x1xf32> to vector<2x1xf32>
    %24 = arith.addf %21, %23 : vector<2x1xf32>
    %c0_22 = arith.constant 0 : index
    %c0_23 = arith.constant 0 : index
    %25 = vector.load %arg10[%c0_22, %c0_23] : memref<2x1xf32, #tpu.memory_space<vmem>>, vector<2x1xf32>
    tpu.vector_store %arg10[%c0_22, %c0_23], %19 {strides = array<i32>} : memref<2x1xf32, #tpu.memory_space<vmem>>, vector<2x1xf32>,
    %cst_24 = arith.constant -2.000000e+01 : f32
    %cst_25 = arith.constant 2.000000e+00 : f32
    %26 = vector.broadcast %cst_24 : f32 to vector<2x1xf32>
    %27 = arith.maximumf %26, %24 : vector<2x1xf32>
    %28 = vector.broadcast %cst_25 : f32 to vector<2x1xf32>
    %29 = arith.minimumf %28, %27 : vector<2x1xf32>
    %c0_26 = arith.constant 0 : index
    %c0_27 = arith.constant 0 : index
    %30 = vector.load %arg11[%c0_26, %c0_27] : memref<2x1xf32, #tpu.memory_space<vmem>>, vector<2x1xf32>
    tpu.vector_store %arg11[%c0_26, %c0_27], %29 {strides = array<i32>} : memref<2x1xf32, #tpu.memory_space<vmem>>, vector<2x1xf32>,
    return
  }
  func.func @transform_0(%arg0: i32) -> (i32, i32) {
    %c0_i32 = arith.constant 0 : i32
    %c0_i32_0 = arith.constant 0 : i32
    return %arg0, %c0_i32 : i32, i32
  }
  func.func @transform_1(%arg0: i32) -> (i32, i32) {
    %c0_i32 = arith.constant 0 : i32
    %c0_i32_0 = arith.constant 0 : i32
    %c0_i32_1 = arith.constant 0 : i32
    return %c0_i32, %c0_i32_0 : i32, i32
  }
  func.func @transform_2(%arg0: i32) -> (i32, i32) {
    %c0_i32 = arith.constant 0 : i32
    %c0_i32_0 = arith.constant 0 : i32
    %c0_i32_1 = arith.constant 0 : i32
    return %c0_i32, %c0_i32_0 : i32, i32
  }
  func.func @transform_3(%arg0: i32) -> (i32, i32) {
    %c0_i32 = arith.constant 0 : i32
    %c0_i32_0 = arith.constant 0 : i32
    %c0_i32_1 = arith.constant 0 : i32
    return %c0_i32, %c0_i32_0 : i32, i32
  }
  func.func @transform_4(%arg0: i32) -> (i32, i32) {
    %c0_i32 = arith.constant 0 : i32
    %c0_i32_0 = arith.constant 0 : i32
    %c0_i32_1 = arith.constant 0 : i32
    return %c0_i32, %c0_i32_0 : i32, i32
  }
  func.func @transform_5(%arg0: i32) -> (i32, i32) {
    %c0_i32 = arith.constant 0 : i32
    %c0_i32_0 = arith.constant 0 : i32
    %c0_i32_1 = arith.constant 0 : i32
    return %c0_i32, %c0_i32_0 : i32, i32
  }
  func.func @transform_6(%arg0: i32) -> (i32, i32) {
    %c0_i32 = arith.constant 0 : i32
    %c0_i32_0 = arith.constant 0 : i32
    %c0_i32_1 = arith.constant 0 : i32
    return %c0_i32, %c0_i32_0 : i32, i32
  }
  func.func @transform_7(%arg0: i32) -> (i32, i32) {
    %c0_i32 = arith.constant 0 : i32
    %c0_i32_0 = arith.constant 0 : i32
    %c0_i32_1 = arith.constant 0 : i32
    return %c0_i32, %c0_i32_0 : i32, i32
  }
  func.func @transform_8(%arg0: i32) -> (i32, i32) {
    %c0_i32 = arith.constant 0 : i32
    %c0_i32_0 = arith.constant 0 : i32
    %c0_i32_1 = arith.constant 0 : i32
    return %c0_i32, %c0_i32_0 : i32, i32
  }
  func.func @transform_9(%arg0: i32) -> (i32, i32) {
    %c0_i32 = arith.constant 0 : i32
    %c0_i32_0 = arith.constant 0 : i32
    return %arg0, %c0_i32 : i32, i32
  }
  func.func @transform_10(%arg0: i32) -> (i32, i32) {
    %c0_i32 = arith.constant 0 : i32
    %c0_i32_0 = arith.constant 0 : i32
    return %arg0, %c0_i32 : i32, i32
  }
}

</mosaic_0001>

<bundles_post_ra>
// kernel: tpu_custom_call.1
= control target key start
LH: loop header
LB: loop body
LE: loop exit
PB: predicated region body
PF: predicated region fallthrough
CT: control target
= control target key end

     0   :  { %s1012_s0 = inlined_call_operand.hbm [shape: f32[2,3], index: 0, kind: input, shape index: {}]   ;;  %s1013_s1 = inlined_call_operand.vmem [shape: f32[3,256], index: 1, kind: input, shape index: {}]   ;;  %s1014_s2 = inlined_call_operand.hbm [shape: f32[1,256], index: 2, kind: input, shape index: {}]   ;;  %s1015_s3 = inlined_call_operand.vmem [shape: f32[256,256], index: 3, kind: input, shape index: {}]   ;;  %s1016_s4 = inlined_call_operand.hbm [shape: f32[1,256], index: 4, kind: input, shape index: {}]   ;;  %s1017_s5 = inlined_call_operand.vmem [shape: f32[256,1], index: 5, kind: input, shape index: {}]   ;;  %s1018_s6 = inlined_call_operand.<no memory space> [shape: f32[1,1], index: 6, kind: input, shape index: {}]   ;;  %s1019_s7 = inlined_call_operand.vmem [shape: f32[256,1], index: 7, kind: input, shape index: {}]   ;;  %s1020_s9 = inlined_call_operand.vmem [shape: f32[2,1], index: 9, kind: output, shape index: {0}]   ;;  %s1021_s10 = inlined_call_operand.vmem [shape: f32[2,1], index: 10, kind: output, shape index: {1}]   ;;  %s1022_s8 = inlined_call_operand.<no memory space> [shape: f32[1,1], index: 8, kind: input, shape index: {}]  }
   0x1   :  { %v16_v0 = vstv %s1018_s6  ;;  %v18_v1 = vstv %s1022_s8 }
   0x2   :  { %17 = vst [vmem:[#allocation2] sm:$0x1] %v16_v0 }
   0x3   :  { %19 = vst [vmem:[#allocation3] sm:$0x1] %v18_v1 }
   0x4   :  { %20 = vsyncpa [#allocation5], 0 }
   0x5   :  { %21 = vsyncpa [#allocation7], 0  ;;  %s40_s19 = sshll.u32 %s1014_s2, 4  ;;  %s546_s20 = smov [#allocation6]   ;;  %s41_s19 = int_to_ptr.hbm [resolvable:$true] %s40_s19 }
   0x6   :  { %s42_s21 = sshll.u32 %s546_s20, 4  ;;  %s27_s6 = sshll.u32 %s1012_s0, 4  ;;  %s43_s21 = int_to_ptr.vmem [resolvable:$true] %s42_s21  ;;  %s28_s6 = int_to_ptr.hbm [resolvable:$true] %s27_s6 }
   0x7   :  { %45 = dma.hbm_to_vmem [thread:$0]  %s41_s19, 32, %s43_s21, [#allocation7]  }
   0x8   :  { %s547_s24 = smov [#allocation4]   ;;  %s53_s27 = sshll.u32 %s1016_s4, 4  ;;  %s54_s27 = int_to_ptr.hbm [resolvable:$true] %s53_s27 }
   0x9   :  { %s29_s8 = sshll.u32 %s547_s24, 4  ;;  %s548_s2 = smov [#allocation8]   ;;  %s30_s8 = int_to_ptr.vmem [resolvable:$true] %s29_s8 }
   0xa   :  { %32 = dma.hbm_to_vmem [thread:$0]  %s28_s6, 32, %s30_s8, [#allocation5]  }
   0xb   :  { %s55_s28 = sshll.u32 %s548_s2, 4  ;;  %s56_s28 = int_to_ptr.vmem [resolvable:$true] %s55_s28 }
   0xc   :  { %58 = dma.hbm_to_vmem [thread:$0]  %s54_s27, 32, %s56_s28, [#allocation7]  }
   0xd   :  { %542 = dma.done.wait [#allocation5], 32  }
   0xe   :  { %543 = vsyncadd [#allocation5], 4294967264 }
   0xf   :  { %544 = dma.done.wait [#allocation7], 64  }
  0x10   :  { %545 = vsyncadd [#allocation7], 4294967232  ;;  %v80_v2 = vld [vmem:[%s1013_s1] sm:$0x77]  ;;  %v172_v3 = vld [vmem:[%s1015_s3 + $0xf0] sm:$0xff]  ;;  %vm95_vm0 = vcmask 1042432  }
  0x11   :  { %88 = vst [vmem:[#allocation1] ss:$2 sm:$0xff] %v80_v2  ;;  %212 = vmatpush.msra.mxu2 %v172_v3  ;;  %v170_v4 = vld [vmem:[%s1015_s3 + $0xe0] sm:$0xff]  ;;  %v204_v5 = vld [vmem:[%s1015_s3 + $0x1f0] sm:$0xff]  ;;  %v79_v11 = vld [vmem:[#allocation4] sm:$0x3] }
  0x12   :  { %232 = vmatpush.msra.mxu3 %v204_v5  ;;  %v168_v6 = vld [vmem:[%s1015_s3 + $0xd0] sm:$0xff]  ;;  %v202_v7 = vld [vmem:[%s1015_s3 + $0x1e0] sm:$0xff]  ;;  %vm91_vm1 = vcmask 23552   ;;  %v173_v12 = vld [vmem:[%s1015_s3 + $0xf8] sm:$0xff]  ;;  %vm446_vm2 = vcmask 1024  }
  0x13   :  { %213 = vmatpush.msra.mxu2 %v170_v4  ;;  %v166_v8 = vld [vmem:[%s1015_s3 + $0xc0] sm:$0xff]  ;;  %v200_v9 = vld [vmem:[%s1015_s3 + $0x1d0] sm:$0xff]  ;;  %v205_v13 = vld [vmem:[%s1015_s3 + $0x1f8] sm:$0xff] }
  0x14   :  { %233 = vmatpush.msra.mxu3 %v202_v7  ;;  %v198_v10 = vld [vmem:[%s1015_s3 + $0x1c0] sm:$0xff]  ;;  %v164_v16 = vld [vmem:[%s1015_s3 + $0xb0] sm:$0xff]  ;;  %v171_v18 = vld [vmem:[%s1015_s3 + $0xe8] sm:$0xff] }
  0x15   :  { %214 = vmatpush.msra.mxu2 %v168_v6  ;;  %v196_v17 = vld [vmem:[%s1015_s3 + $0x1b0] sm:$0xff]  ;;  %v203_v19 = vld [vmem:[%s1015_s3 + $0x1e8] sm:$0xff]  ;;  %v162_v20 = vld [vmem:[%s1015_s3 + $0xa0] sm:$0xff] }
  0x16   :  { %234 = vmatpush.msra.mxu3 %v200_v9  ;;  %v194_v21 = vld [vmem:[%s1015_s3 + $0x1a0] sm:$0xff]  ;;  %v169_v22 = vld [vmem:[%s1015_s3 + $0xd8] sm:$0xff]  ;;  %v160_v24 = vld [vmem:[%s1015_s3 + $0x90] sm:$0xff] }
  0x17   :  { %215 = vmatpush.msra.mxu2 %v166_v8  ;;  %v201_v23 = vld [vmem:[%s1015_s3 + $0x1d8] sm:$0xff]  ;;  %v192_v25 = vld [vmem:[%s1015_s3 + $0x190] sm:$0xff]  ;;  %v167_v26 = vld [vmem:[%s1015_s3 + $0xc8] sm:$0xff] }
  0x18   :  { %v89_v14 = vld.sshfl [vmem:[#allocation1] sm:$0xff pattern:$0x75316420]  ;;  %v90_v15 = vld.sshfl [vmem:[#allocation1 + $0x8] sm:$0xff pattern:$0x75316420]  ;;  %235 = vmatpush.msra.mxu3 %v198_v10 }
  0x19   :  { %461 = vmatpush.msk.msra.mxu0 %vm95_vm0, %v89_v14  ;;  %463 = vmatpush.msk.msra.mxu1 %vm95_vm0, %v90_v15  ;;  %v199_v27 = vld [vmem:[%s1015_s3 + $0x1c8] sm:$0xff]  ;;  %v158_v28 = vld [vmem:[%s1015_s3 + $0x80] sm:$0xff]  ;;  %v165_v30 = vld [vmem:[%s1015_s3 + $0xb8] sm:$0xff] }
  0x1a   :  { %462 = vmatmul.msk.f32.vlgmr.msra.gmra.mxu0 %vm91_vm1, %v79_v11  ;;  %464 = vmatmul.msk.f32.vlgmr.msra.gmra.mxu1 %vm91_vm1, %v79_v11  ;;  %v190_v29 = vld [vmem:[%s1015_s3 + $0x180] sm:$0xff]  ;;  %v197_v31 = vld [vmem:[%s1015_s3 + $0x1b8] sm:$0xff]  ;;  %v156_v32 = vld [vmem:[%s1015_s3 + $0x70] sm:$0xff] }
  0x1b   :  { %252 = vmatpush.msrb.mxu0 %v173_v12  ;;  %272 = vmatpush.msrb.mxu1 %v205_v13  ;;  %v188_v33 = vld [vmem:[%s1015_s3 + $0x170] sm:$0xff]  ;;  %v163_v34 = vld [vmem:[%s1015_s3 + $0xa8] sm:$0xff]  ;;  %v154_v36 = vld [vmem:[%s1015_s3 + $0x60] sm:$0xff] }
  0x1c   :  { %216 = vmatpush.msra.mxu2 %v164_v16  ;;  %236 = vmatpush.msra.mxu3 %v196_v17  ;;  %v195_v35 = vld [vmem:[%s1015_s3 + $0x1a8] sm:$0xff]  ;;  %v186_v37 = vld [vmem:[%s1015_s3 + $0x160] sm:$0xff]  ;;  %v161_v38 = vld [vmem:[%s1015_s3 + $0x98] sm:$0xff] }
  0x1d   :  { %253 = vmatpush.msrb.mxu0 %v171_v18  ;;  %273 = vmatpush.msrb.mxu1 %v203_v19  ;;  %v193_v39 = vld [vmem:[%s1015_s3 + $0x198] sm:$0xff]  ;;  %v152_v40 = vld [vmem:[%s1015_s3 + $0x50] sm:$0xff]  ;;  %v159_v42 = vld [vmem:[%s1015_s3 + $0x88] sm:$0xff] }
  0x1e   :  { %217 = vmatpush.msra.mxu2 %v162_v20  ;;  %237 = vmatpush.msra.mxu3 %v194_v21  ;;  %v184_v41 = vld [vmem:[%s1015_s3 + $0x150] sm:$0xff]  ;;  %v191_v43 = vld [vmem:[%s1015_s3 + $0x188] sm:$0xff]  ;;  %v150_v44 = vld [vmem:[%s1015_s3 + $0x40] sm:$0xff] }
  0x1f   :  { %254 = vmatpush.msrb.mxu0 %v169_v22  ;;  %274 = vmatpush.msrb.mxu1 %v201_v23  ;;  %v182_v45 = vld [vmem:[%s1015_s3 + $0x140] sm:$0xff]  ;;  %v157_v46 = vld [vmem:[%s1015_s3 + $0x78] sm:$0xff]  ;;  %v148_v48 = vld [vmem:[%s1015_s3 + $0x30] sm:$0xff] }
  0x20   :  { %218 = vmatpush.msra.mxu2 %v160_v24  ;;  %238 = vmatpush.msra.mxu3 %v192_v25  ;;  %v189_v47 = vld [vmem:[%s1015_s3 + $0x178] sm:$0xff]  ;;  %v155_v49 = vld [vmem:[%s1015_s3 + $0x68] sm:$0xff]  ;;  %v146_v56 = vld [vmem:[%s1015_s3 + $0x20] sm:$0xff] }
  0x21   :  { %255 = vmatpush.msrb.mxu0 %v167_v26  ;;  %275 = vmatpush.msrb.mxu1 %v199_v27  ;;  %v187_v50 = vld [vmem:[%s1015_s3 + $0x168] sm:$0xff]  ;;  %v153_v51 = vld [vmem:[%s1015_s3 + $0x58] sm:$0xff]  ;;  %v180_v57 = vld [vmem:[%s1015_s3 + $0x130] sm:$0xff] }
  0x22   :  { %219 = vmatpush.msra.mxu2 %v158_v28  ;;  %239 = vmatpush.msra.mxu3 %v190_v29  ;;  %v185_v52 = vld [vmem:[%s1015_s3 + $0x158] sm:$0xff]  ;;  %v151_v53 = vld [vmem:[%s1015_s3 + $0x48] sm:$0xff]  ;;  %v144_v60 = vld [vmem:[%s1015_s3 + $0x10] sm:$0xff] }
  0x23   :  { %256 = vmatpush.msrb.mxu0 %v165_v30  ;;  %276 = vmatpush.msrb.mxu1 %v197_v31  ;;  %v183_v54 = vld [vmem:[%s1015_s3 + $0x148] sm:$0xff]  ;;  %v149_v55 = vld [vmem:[%s1015_s3 + $0x38] sm:$0xff]  ;;  %v178_v61 = vld [vmem:[%s1015_s3 + $0x120] sm:$0xff] }
  0x24   :  { %220 = vmatpush.msra.mxu2 %v156_v32  ;;  %240 = vmatpush.msra.mxu3 %v188_v33  ;;  %v147_v58 = vld [vmem:[%s1015_s3 + $0x28] sm:$0xff]  ;;  %v181_v59 = vld [vmem:[%s1015_s3 + $0x138] sm:$0xff]  ;;  %v142_v0 = vld [vmem:[%s1015_s3] sm:$0xff] }
  0x25   :  { %257 = vmatpush.msrb.mxu0 %v163_v34  ;;  %277 = vmatpush.msrb.mxu1 %v195_v35  ;;  %v145_v62 = vld [vmem:[%s1015_s3 + $0x18] sm:$0xff]  ;;  %v179_v63 = vld [vmem:[%s1015_s3 + $0x128] sm:$0xff]  ;;  %v176_v1 = vld [vmem:[%s1015_s3 + $0x110] sm:$0xff] }
  0x26   :  { %221 = vmatpush.msra.mxu2 %v154_v36  ;;  %241 = vmatpush.msra.mxu3 %v186_v37  ;;  %v143_v2 = vld [vmem:[%s1015_s3 + $0x8] sm:$0xff]  ;;  %v177_v3 = vld [vmem:[%s1015_s3 + $0x118] sm:$0xff]  ;;  %v174_v4 = vld [vmem:[%s1015_s3 + $0x100] sm:$0xff] }
  0x27   :  { %258 = vmatpush.msrb.mxu0 %v161_v38  ;;  %278 = vmatpush.msrb.mxu1 %v193_v39  ;;  %v175_v5 = vld [vmem:[%s1015_s3 + $0x108] sm:$0xff]  ;;  %v325_v6 = vld [vmem:[%s1017_s5 + $0xf8] sm:$0xff]  ;;  %v324_v8 = vld [vmem:[%s1017_s5 + $0xf0] sm:$0xff] }
  0x28   :  { %222 = vmatpush.msra.mxu2 %v152_v40  ;;  %242 = vmatpush.msra.mxu3 %v184_v41  ;;  %v401_v7 = vld [vmem:[%s1019_s7 + $0xf8] sm:$0xff]  ;;  %v400_v9 = vld [vmem:[%s1019_s7 + $0xf0] sm:$0xff]  ;;  %v323_v10 = vld [vmem:[%s1017_s5 + $0xe8] sm:$0xff] }
  0x29   :  { %259 = vmatpush.msrb.mxu0 %v159_v42  ;;  %279 = vmatpush.msrb.mxu1 %v191_v43  ;;  %v309_v11 = vld [vmem:[%s1017_s5 + $0x78] sm:$0xff]  ;;  %v399_v13 = vld [vmem:[%s1019_s7 + $0xe8] sm:$0xff]  ;;  %v308_v14 = vld [vmem:[%s1017_s5 + $0x70] sm:$0xff] }
  0x2a   :  { %223 = vmatpush.msra.mxu2 %v150_v44  ;;  %243 = vmatpush.msra.mxu3 %v182_v45  ;;  %v385_v12 = vld [vmem:[%s1019_s7 + $0x78] sm:$0xff]  ;;  %v322_v15 = vld [vmem:[%s1017_s5 + $0xe0] sm:$0xff]  ;;  %v384_v16 = vld [vmem:[%s1019_s7 + $0x70] sm:$0xff] }
  0x2b   :  { %260 = vmatpush.msrb.mxu0 %v157_v46  ;;  %280 = vmatpush.msrb.mxu1 %v189_v47  ;;  %v307_v17 = vld [vmem:[%s1017_s5 + $0x68] sm:$0xff]  ;;  %v398_v18 = vld [vmem:[%s1019_s7 + $0xe0] sm:$0xff]  ;;  %v321_v20 = vld [vmem:[%s1017_s5 + $0xd8] sm:$0xff] }
  0x2c   :  { %224 = vmatpush.msra.mxu2 %v148_v48  ;;  %244 = vmatpush.msra.mxu3 %v180_v57  ;;  %v383_v19 = vld [vmem:[%s1019_s7 + $0x68] sm:$0xff]  ;;  %v306_v21 = vld [vmem:[%s1017_s5 + $0x60] sm:$0xff]  ;;  %v397_v22 = vld [vmem:[%s1019_s7 + $0xd8] sm:$0xff] }
  0x2d   :  { %261 = vmatpush.msrb.mxu0 %v155_v49  ;;  %281 = vmatpush.msrb.mxu1 %v187_v50  ;;  %v382_v23 = vld [vmem:[%s1019_s7 + $0x60] sm:$0xff]  ;;  %v320_v24 = vld [vmem:[%s1017_s5 + $0xd0] sm:$0xff]  ;;  %v305_v25 = vld [vmem:[%s1017_s5 + $0x58] sm:$0xff] }
  0x2e   :  { %225 = vmatpush.msra.mxu2 %v146_v56  ;;  %245 = vmatpush.msra.mxu3 %v178_v61  ;;  %v396_v26 = vld [vmem:[%s1019_s7 + $0xd0] sm:$0xff]  ;;  %v381_v27 = vld [vmem:[%s1019_s7 + $0x58] sm:$0xff]  ;;  %v319_v28 = vld [vmem:[%s1017_s5 + $0xc8] sm:$0xff] }
  0x2f   :  { %262 = vmatpush.msrb.mxu0 %v153_v51  ;;  %282 = vmatpush.msrb.mxu1 %v185_v52  ;;  %v304_v29 = vld [vmem:[%s1017_s5 + $0x50] sm:$0xff]  ;;  %v395_v30 = vld [vmem:[%s1019_s7 + $0xc8] sm:$0xff]  ;;  %v318_v32 = vld [vmem:[%s1017_s5 + $0xc0] sm:$0xff] }
  0x30   :  { %226 = vmatpush.msra.mxu2 %v144_v60  ;;  %246 = vmatpush.msra.mxu3 %v176_v1  ;;  %v380_v31 = vld [vmem:[%s1019_s7 + $0x50] sm:$0xff]  ;;  %v303_v33 = vld [vmem:[%s1017_s5 + $0x48] sm:$0xff]  ;;  %v394_v34 = vld [vmem:[%s1019_s7 + $0xc0] sm:$0xff] }
  0x31   :  { %263 = vmatpush.msrb.mxu0 %v151_v53  ;;  %283 = vmatpush.msrb.mxu1 %v183_v54  ;;  %v379_v35 = vld [vmem:[%s1019_s7 + $0x48] sm:$0xff]  ;;  %v317_v36 = vld [vmem:[%s1017_s5 + $0xb8] sm:$0xff]  ;;  %v302_v37 = vld [vmem:[%s1017_s5 + $0x40] sm:$0xff] }
  0x32   :  { %227 = vmatpush.msra.mxu2 %v142_v0  ;;  %247 = vmatpush.msra.mxu3 %v174_v4  ;;  %v393_v38 = vld [vmem:[%s1019_s7 + $0xb8] sm:$0xff]  ;;  %v378_v39 = vld [vmem:[%s1019_s7 + $0x40] sm:$0xff]  ;;  %v316_v40 = vld [vmem:[%s1017_s5 + $0xb0] sm:$0xff] }
  0x33   :  { %264 = vmatpush.msrb.mxu0 %v149_v55  ;;  %284 = vmatpush.msrb.mxu1 %v181_v59  ;;  %v301_v41 = vld [vmem:[%s1017_s5 + $0x38] sm:$0xff]  ;;  %v392_v42 = vld [vmem:[%s1019_s7 + $0xb0] sm:$0xff]  ;;  %v315_v44 = vld [vmem:[%s1017_s5 + $0xa8] sm:$0xff] }
  0x34   :  { %350 = vmatpush.msrb.mxu3 %v325_v6  ;;  %330 = vmatpush.msrb.mxu2 %v309_v11  ;;  %v377_v43 = vld [vmem:[%s1019_s7 + $0x38] sm:$0xff]  ;;  %v391_v45 = vld [vmem:[%s1019_s7 + $0xa8] sm:$0xff]  ;;  %v314_v47 = vld [vmem:[%s1017_s5 + $0xa0] sm:$0xff] }
  0x35   :  { %265 = vmatpush.msrb.mxu0 %v147_v58  ;;  %285 = vmatpush.msrb.mxu1 %v179_v63  ;;  %v81_v46 = vld [vmem:[#allocation6] sm:$0x3]  ;;  %v390_v48 = vld [vmem:[%s1019_s7 + $0xa0] sm:$0xff]  ;;  %v300_v57 = vld [vmem:[%s1017_s5 + $0x30] sm:$0xff] }
  0x36   :  { %351 = vmatpush.msrb.mxu3 %v324_v8  ;;  %331 = vmatpush.msrb.mxu2 %v308_v14  ;;  %v83_v49 = vperm.slane %v81_v46, 0  ;;  %v84_v50 = vperm.slane %v81_v46, 1  ;;  %v313_v58 = vld [vmem:[%s1017_s5 + $0x98] sm:$0xff]  ;;  %v376_v59 = vld [vmem:[%s1019_s7 + $0x30] sm:$0xff]  ;;  %v299_v61 = vld [vmem:[%s1017_s5 + $0x28] sm:$0xff] }
  0x37   :  { %266 = vmatpush.msrb.mxu0 %v145_v62  ;;  %286 = vmatpush.msrb.mxu1 %v177_v3  ;;  %v389_v60 = vld [vmem:[%s1019_s7 + $0x98] sm:$0xff]  ;;  %v312_v62 = vld [vmem:[%s1017_s5 + $0x90] sm:$0xff]  ;;  %v375_v63 = vld [vmem:[%s1019_s7 + $0x28] sm:$0xff] }
  0x38   :  { %352 = vmatpush.msrb.mxu3 %v323_v10  ;;  %332 = vmatpush.msrb.mxu2 %v307_v17  ;;  %v388_v0 = vld [vmem:[%s1019_s7 + $0x90] sm:$0xff]  ;;  %v298_v1 = vld [vmem:[%s1017_s5 + $0x20] sm:$0xff]  ;;  %v387_v4 = vld [vmem:[%s1019_s7 + $0x88] sm:$0xff] }
  0x39   :  { %267 = vmatpush.msrb.mxu0 %v143_v2  ;;  %287 = vmatpush.msrb.mxu1 %v175_v5  ;;  %v311_v2 = vld [vmem:[%s1017_s5 + $0x88] sm:$0xff]  ;;  %v374_v3 = vld [vmem:[%s1019_s7 + $0x20] sm:$0xff]  ;;  %v297_v5 = vld [vmem:[%s1017_s5 + $0x18] sm:$0xff] }
  0x3a   :  { %353 = vmatpush.msrb.mxu3 %v322_v15  ;;  %333 = vmatpush.msrb.mxu2 %v306_v21  ;;  %v310_v6 = vld [vmem:[%s1017_s5 + $0x80] sm:$0xff]  ;;  %v372_v10 = vld [vmem:[%s1019_s7 + $0x10] sm:$0xff]  ;;  %v295_v11 = vld [vmem:[%s1017_s5 + $0x8] sm:$0xff] }
  0x3b   :  { %426 = vmatpush.msra.mxu1 %v401_v7  ;;  %406 = vmatpush.msra.mxu0 %v385_v12  ;;  %v373_v7 = vld [vmem:[%s1019_s7 + $0x18] sm:$0xff]  ;;  %v386_v8 = vld [vmem:[%s1019_s7 + $0x80] sm:$0xff]  ;;  %v371_v12 = vld [vmem:[%s1019_s7 + $0x8] sm:$0xff] }
  0x3c   :  { %354 = vmatpush.msrb.mxu3 %v321_v20  ;;  %334 = vmatpush.msrb.mxu2 %v305_v25  ;;  %v370_v14 = vld [vmem:[%s1019_s7] sm:$0xff]  ;;  %v206_v15 = vld [vmem:[#allocation8] sm:$0x3] }
  0x3d   :  { %427 = vmatpush.msra.mxu1 %v400_v9  ;;  %407 = vmatpush.msra.mxu0 %v384_v16  ;;  %v296_v9 = vld [vmem:[%s1017_s5 + $0x10] sm:$0xff]  ;;  %v209_v16 = vperm.slane %v206_v15, 1  ;;  %v208_v21 = vperm.slane %v206_v15, 0 }
  0x3e   :  { %355 = vmatpush.msrb.mxu3 %v320_v24  ;;  %335 = vmatpush.msrb.mxu2 %v304_v29 }
  0x3f   :  { %428 = vmatpush.msra.mxu1 %v399_v13  ;;  %408 = vmatpush.msra.mxu0 %v383_v19  ;;  %v294_v13 = vld [vmem:[%s1017_s5] sm:$0xff] }
  0x40   :  { %356 = vmatpush.msrb.mxu3 %v319_v28  ;;  %336 = vmatpush.msrb.mxu2 %v303_v33  ;;  %v468_v28 = vld [vmem:[#allocation3] ss:$0 sm:$0xff]  ;;  %v469_v33 = vld [vmem:[#allocation2] ss:$0 sm:$0xff] }
  0x41   :  { %429 = vmatpush.msra.mxu1 %v398_v18  ;;  %409 = vmatpush.msra.mxu0 %v382_v23 }
  0x42   :  { %357 = vmatpush.msrb.mxu3 %v318_v32  ;;  %337 = vmatpush.msrb.mxu2 %v302_v37 }
  0x43   :  { %430 = vmatpush.msra.mxu1 %v397_v22  ;;  %410 = vmatpush.msra.mxu0 %v381_v27 }
  0x44   :  { %358 = vmatpush.msrb.mxu3 %v317_v36  ;;  %338 = vmatpush.msrb.mxu2 %v301_v41 }
  0x45   :  { %431 = vmatpush.msra.mxu1 %v396_v26  ;;  %411 = vmatpush.msra.mxu0 %v380_v31 }
  0x46   :  { %359 = vmatpush.msrb.mxu3 %v316_v40  ;;  %339 = vmatpush.msrb.mxu2 %v300_v57 }
  0x47   :  { %432 = vmatpush.msra.mxu1 %v395_v30  ;;  %412 = vmatpush.msra.mxu0 %v379_v35 }
  0x48   :  { %360 = vmatpush.msrb.mxu3 %v315_v44  ;;  %340 = vmatpush.msrb.mxu2 %v299_v61 }
  0x49   :  { %433 = vmatpush.msra.mxu1 %v394_v34  ;;  %413 = vmatpush.msra.mxu0 %v378_v39 }
  0x4a   :  { %361 = vmatpush.msrb.mxu3 %v314_v47  ;;  %341 = vmatpush.msrb.mxu2 %v298_v1 }
  0x4b   :  { %434 = vmatpush.msra.mxu1 %v393_v38  ;;  %414 = vmatpush.msra.mxu0 %v377_v43 }
  0x4c   :  { %362 = vmatpush.msrb.mxu3 %v313_v58  ;;  %342 = vmatpush.msrb.mxu2 %v297_v5 }
  0x4d   :  { %435 = vmatpush.msra.mxu1 %v392_v42  ;;  %415 = vmatpush.msra.mxu0 %v376_v59 }
  0x4e   :  { %363 = vmatpush.msrb.mxu3 %v312_v62  ;;  %343 = vmatpush.msrb.mxu2 %v296_v9 }
  0x4f   :  { %436 = vmatpush.msra.mxu1 %v391_v45  ;;  %416 = vmatpush.msra.mxu0 %v375_v63 }
  0x50   :  { %364 = vmatpush.msrb.mxu3 %v311_v2  ;;  %344 = vmatpush.msrb.mxu2 %v295_v11 }
  0x51   :  { %437 = vmatpush.msra.mxu1 %v390_v48  ;;  %417 = vmatpush.msra.mxu0 %v374_v3 }
  0x52   :  { %365 = vmatpush.msrb.mxu3 %v310_v6  ;;  %345 = vmatpush.msrb.mxu2 %v294_v13 }
  0x53   :  { %438 = vmatpush.msra.mxu1 %v389_v60  ;;  %418 = vmatpush.msra.mxu0 %v373_v7 }
  0x55   :  { %439 = vmatpush.msra.mxu1 %v388_v0  ;;  %419 = vmatpush.msra.mxu0 %v372_v10 }
  0x57   :  { %440 = vmatpush.msra.mxu1 %v387_v4  ;;  %420 = vmatpush.msra.mxu0 %v371_v12 }
  0x59   :  { %441 = vmatpush.msra.mxu1 %v386_v8  ;;  %421 = vmatpush.msra.mxu0 %v370_v14 }
  0x97   :  { %v117_v51 = vpop.f32.mrf.mxu0  ;;  %v137_v52 = vpop.f32.mrf.mxu1 }
  0x98   :  { %v118_v53 = vadd.f32 %v117_v51, %v83_v49  ;;  %v138_v54 = vadd.f32 %v137_v52, %v84_v50 }
  0x9a   :  { %v140_v55 = vmax.f32 %v118_v53, 0.0  ;;  %v141_v56 = vmax.f32 %v138_v54, 0.0 }
  0x9c   :  { %228 = vmatmul.f32.vlgmr.msra.gmra.mxu2 %v140_v55  ;;  %268 = vmatmul.f32.vlgmr.msrb.gmra.mxu0 %v140_v55 }
  0x9d   :  { %248 = vmatmul.f32.vlgmr.msra.gmra.mxu3 %v141_v56  ;;  %288 = vmatmul.f32.vlgmr.msrb.gmra.mxu1 %v141_v56 }
 0x119   :  { %v269_v17 = vpop.f32.mrf.mxu0 }
 0x11a   :  { %v270_v18 = vadd.f32 %v269_v17, %v209_v16  ;;  %v289_v19 = vpop.f32.mrf.mxu1 }
 0x11c   :  { %v290_v20 = vadd.f32 %v289_v19, %v270_v18 }
 0x11e   :  { %v293_v22 = vmax.f32 %v290_v20, 0.0 }
 0x11f   :  { %v229_v23 = vpop.f32.mrf.mxu2 }
 0x120   :  { %v230_v24 = vadd.f32 %v229_v23, %v208_v21  ;;  %366 = vmatmul.f32.vlgmr.msrb.gmra.mxu3 %v293_v22  ;;  %442 = vmatmul.f32.vlgmr.msra.gmra.mxu1 %v293_v22  ;;  %v249_v25 = vpop.f32.mrf.mxu3 }
 0x122   :  { %v250_v26 = vadd.f32 %v249_v25, %v230_v24 }
 0x124   :  { %v292_v27 = vmax.f32 %v250_v26, 0.0 }
 0x126   :  { %346 = vmatmul.f32.vlgmr.msrb.gmra.mxu2 %v292_v27  ;;  %422 = vmatmul.f32.vlgmr.msra.gmra.mxu0 %v292_v27 }
 0x19d   :  { %v443_v31 = vpop.f32.mrf.mxu1 }
 0x1a3   :  { %v423_v29 = vpop.f32.mrf.mxu0  ;;  %v367_v38 = vpop.f32.mrf.mxu3 }
 0x1a4   :  { %v424_v30 = vadd.f32 %v468_v28, %v423_v29 }
 0x1a6   :  { %v444_v32 = vadd.f32 %v443_v31, %v424_v30 }
 0x1a8   :  { %v448_v34 = vmax.f32 %v444_v32, -20.0 }
 0x1a9   :  { %v347_v35 = vpop.f32.mrf.mxu2 }
 0x1aa   :  { %v449_v36 = vmin.f32 %v448_v34, 2.0  ;;  %v348_v37 = vadd.f32 %v469_v33, %v347_v35 }
 0x1ac   :  { %450 = vst.msk [vmem:[%s1021_s10] sm:$0x3] %vm446_vm2, %v449_v36  ;;  %v368_v39 = vadd.f32 %v367_v38, %v348_v37 }
 0x1ae   :  { %447 = vst.msk [vmem:[%s1020_s9] sm:$0x3] %vm446_vm2, %v368_v39 }
 0x1af   :  { %459 = vsyncpa [#allocation5], 1 }
 0x1b0   :  { %460 = vsyncpa [#allocation7], 1 }

</bundles_post_ra>
